<compile_context>
chip_gen: v6e
topology: v6e:2x2x1
jax: 0.10.0
libtpu: 0.0.40
codegen_flags: <defaults>
</compile_context>

<pallas_src>
import math

import jax
import jax.numpy as jnp
from jax.experimental import pallas as pl
from jax.experimental.pallas import tpu as pltpu


# ---------------------------------------------------------------------------
# Activation
# ---------------------------------------------------------------------------
def _activation(name):
    if name == "relu":
        return lambda x: jnp.maximum(x, 0.0)
    if name == "gelu":
        return lambda x: jax.nn.gelu(x, approximate=False)
    if name == "tanh":
        return jnp.tanh
    if name == "sigmoid":
        return jax.nn.sigmoid
    raise ValueError(f"Unsupported activation function: {name}")


# ---------------------------------------------------------------------------
# Fused multi-layer encoder kernel
# ---------------------------------------------------------------------------
def make_encoder_kernel(Bt, S, D, H, n_ffn, activation_fn, eps=1e-5):
    act = _activation(activation_fn)
    hd = D // H
    Nt = Bt * S
    BHt = Bt * H
    bf16 = jnp.bfloat16
    f32 = jnp.float32

    def layernorm(x, g, b):
        # single pass: var = E[x^2] - mean^2 (two independent lane reductions)
        mean = jnp.mean(x, axis=-1, keepdims=True)
        msq = jnp.mean(x * x, axis=-1, keepdims=True)
        var = msq - mean * mean
        return (x - mean) * jax.lax.rsqrt(var + eps) * g + b

    def kernel(*refs):
        (x_ref, wqkv_ref, bqkv_ref, wo_ref, bo_ref, g1_ref, b1_ref) = refs[:7]
        ffn_refs = refs[7:7 + 2 * n_ffn]
        g2_ref, b2_ref, o_ref = refs[7 + 2 * n_ffn:]

        layer = pl.program_id(1)

        # Layer 0: seed the VMEM-resident output block; it then carries the running
        # activations across the whole sequential layer axis (constant block index).
        @pl.when(layer == 0)
        def _():
            o_ref[...] = x_ref[...]

        x = o_ref[...].reshape(Nt, D)                         # (N, D) f32, rows = (b, s)

        # ---- fused QKV projection: one lane-dense (N,D)@(D,3D) MXU matmul ----------
        qkv = jnp.dot(x.astype(bf16), wqkv_ref[...],
                      preferred_element_type=f32) + bqkv_ref[...]        # (N, 3D) f32

        # head split via batched minor-two-dim swaps + sublane-aligned reshapes only
        qkvT = jnp.swapaxes(qkv.reshape(Bt, S, 3 * D), 1, 2)             # (Bt, 3D, S)
        qT = qkvT[:, 0 * D:1 * D].reshape(BHt, hd, S)                    # (BH, hd, S)
        kT = qkvT[:, 1 * D:2 * D].reshape(BHt, hd, S)
        vT = qkvT[:, 2 * D:3 * D].reshape(BHt, hd, S)
        q = jnp.swapaxes(qT, 1, 2).astype(bf16)                          # (BH, S, hd)
        k = kT.astype(bf16)                                              # (BH, hd, S)
        v = vT.astype(bf16)                                              # (BH, hd, S)

        # scores: 1/sqrt(hd) already folded into wq/bq by the wrapper
        s = jnp.einsum("bqd,bdk->bqk", q, k, preferred_element_type=f32)  # (BH, S, S)
        s = s - jnp.max(s, axis=-1, keepdims=True)
        p = jnp.exp(s)
        p = p * pl.reciprocal(jnp.sum(p, axis=-1, keepdims=True), approx=True)

        # context in feature-major form, then merge heads back to (N, D)
        ctxT = jnp.einsum("bdk,bqk->bdq", v, p.astype(bf16),
                          preferred_element_type=f32)                    # (BH, hd, S)
        ctx = jnp.swapaxes(ctxT.reshape(Bt, D, S), 1, 2).reshape(Nt, D)  # (N, D) f32

        # dense output projection: one (N,D)@(D,D) matmul over concatenated heads
        attn = jnp.dot(ctx.astype(bf16), wo_ref[...],
                       preferred_element_type=f32) + bo_ref[...]         # (N, D)

        # ---- residual + LayerNorm 1 -------------------------------------------------
        x = layernorm(x + attn, g1_ref[...], b1_ref[...])

        # ---- feed-forward network ---------------------------------------------------
        h = x
        for i in range(n_ffn):
            w = ffn_refs[2 * i][...]                                     # (in, out) bf16
            b = ffn_refs[2 * i + 1][...]                                 # (1, out) f32
            h = jnp.dot(h.astype(bf16), w, preferred_element_type=f32) + b
            if i < n_ffn - 1:
                h = act(h)

        # ---- residual + LayerNorm 2 -------------------------------------------------
        x = layernorm(x + h, g2_ref[...], b2_ref[...])
        o_ref[...] = x.reshape(Bt, S, D).astype(o_ref.dtype)

    return kernel


def transformer_encoder_pallas(x_sbd, all_params, num_heads, activation_fn):
    S, B, D = x_sbd.shape
    H = num_heads
    assert D % H == 0, "dim_model must be divisible by num_heads"
    hd = D // H
    # head-split reshapes assume per-head features fill whole f32 sublane tiles
    assert hd % 8 == 0, "this kernel requires head_dim to be a multiple of 8"
    L = len(all_params)
    n_ffn = len(all_params[0]["ffn"])
    bf16 = jnp.bfloat16
    scale = 1.0 / math.sqrt(hd)

    # batch grid: 2 tiles when possible so v7x's 2 TensorCores both get work
    n_bt = 2 if (B >= 2 and B % 2 == 0) else 1
    Bt = B // n_bt
    Nt = Bt * S

    # ---- wrapper-side (free) weight re-layout: fused QKV^T, Wout^T, bf16 casts -----
    def per_layer_args(p):
        wq, wk, wv = jnp.split(p["wqkv"], 3, axis=0)          # (D, D) each, (out, in)
        bq, bk, bv = jnp.split(p["bqkv"], 3)
        # fused W_qkv^T (D, 3D) with the softmax scale folded into the q slice/bias
        wqkv_t = jnp.concatenate([wq.T * scale, wk.T, wv.T], axis=1).astype(bf16)
        bqkv = jnp.concatenate([bq * scale, bk, bv])[None, :].astype(jnp.float32)
        args = [wqkv_t, bqkv,
                p["wout"].T.astype(bf16),                     # (D, D)
                p["bout"][None, :].astype(jnp.float32),       # (1, D)
                p["ln1_g"][None, :].astype(jnp.float32),
                p["ln1_b"][None, :].astype(jnp.float32)]
        for (w, b) in p["ffn"]:
            args += [w.T.astype(bf16), b[None, :].astype(jnp.float32)]
        args += [p["ln2_g"][None, :].astype(jnp.float32),
                 p["ln2_b"][None, :].astype(jnp.float32)]
        return args

    layer_args = [per_layer_args(p) for p in all_params]
    stacked = [jnp.stack(a) for a in zip(*layer_args)]        # each (L, ...)

    # (S, B, D) -> (B, S, D): single boundary transpose (PyTorch MHA is batch_first=False)
    x_bsd = jnp.transpose(x_sbd, (1, 0, 2))

    # ---- BlockSpecs: activations resident across the layer axis; weights streamed ---
    in_specs = [pl.BlockSpec((Bt, S, D), lambda b, l: (b, 0, 0))]
    for a in stacked:
        nd = a.ndim
        in_specs.append(
            pl.BlockSpec((None,) + a.shape[1:],
                         lambda b, l, _nd=nd: (l,) + (0,) * (_nd - 1)))
    out_spec = pl.BlockSpec((Bt, S, D), lambda b, l: (b, 0, 0))

    # ---- explicit VMEM budget --------------------------------------------------------
    per_layer_w = sum(int(math.prod(a.shape[1:])) * a.dtype.itemsize for a in stacked)
    need = (2 * per_layer_w               # double-buffered weight stream
            + 3 * Nt * D * 4              # resident out block + double-buffered x block
            + 2 * Nt * 3 * D * 4          # fused qkv + relayout copies
            + 4 * Bt * H * S * S * 4      # scores / softmax intermediates
            + (8 << 20))                  # headroom
    vmem_limit = int(min(56 << 20, max(32 << 20, need)))      # 56 MiB cap fits v7x too

    # ---- advisory cost estimate --------------------------------------------------------
    N = B * S
    ffn_io = [(w.shape[1], w.shape[0]) for (w, _b) in all_params[0]["ffn"]]   # (in, out)
    flops_layer = (2 * N * D * 3 * D            # fused QKV projection
                   + 2 * 2 * B * S * S * D      # scores + P@V
                   + 2 * N * D * D              # output projection
                   + sum(2 * N * i * o for (i, o) in ffn_io))
    trans_layer = B * H * S * S + B * H * S + 2 * N
    weight_bytes = sum(int(a.size) * a.dtype.itemsize for a in stacked)
    cost = pl.CostEstimate(flops=int(L * flops_layer),
                           transcendentals=int(L * trans_layer),
                           bytes_accessed=int(2 * N * D * 4 + n_bt * weight_bytes))

    kernel = make_encoder_kernel(Bt, S, D, H, n_ffn, activation_fn)
    out_bsd = pl.pallas_call(
        kernel,
        out_shape=jax.ShapeDtypeStruct((B, S, D), jnp.float32),
        grid=(n_bt, L),
        in_specs=in_specs,
        out_specs=out_spec,
        compiler_params=pltpu.CompilerParams(
            dimension_semantics=("parallel", "arbitrary"),
            vmem_limit_bytes=vmem_limit),
        cost_estimate=cost,
    )(x_bsd, *stacked)

    return jnp.transpose(out_bsd, (1, 0, 2))                  # back to (S, B, D)


# ---------------------------------------------------------------------------
# Deterministic parameter init (synthetic, PyTorch weight convention (out, in))
# ---------------------------------------------------------------------------
def init_encoder_params(key, dim_model, hidden_dims, num_layers):
    params = []
    for _ in range(num_layers):
        key, k0, k1, k2, k3 = jax.random.split(key, 5)
        layer = {
            "wqkv": 0.05 * jax.random.normal(k0, (3 * dim_model, dim_model), jnp.float32),
            "bqkv": 0.01 * jax.random.normal(k1, (3 * dim_model,), jnp.float32),
            "wout": 0.05 * jax.random.normal(k2, (dim_model, dim_model), jnp.float32),
            "bout": 0.01 * jax.random.normal(k3, (dim_model,), jnp.float32),
            "ln1_g": jnp.ones((dim_model,), jnp.float32),
            "ln1_b": jnp.zeros((dim_model,), jnp.float32),
            "ln2_g": jnp.ones((dim_model,), jnp.float32),
            "ln2_b": jnp.zeros((dim_model,), jnp.float32),
        }
        ffn = []
        in_dim = dim_model
        for h in list(hidden_dims) + [dim_model]:
            key, kw, kb = jax.random.split(key, 3)
            w = 0.05 * jax.random.normal(kw, (h, in_dim), jnp.float32)
            b = 0.01 * jax.random.normal(kb, (h,), jnp.float32)
            ffn.append((w, b))
            in_dim = h
        layer["ffn"] = ffn
        params.append(layer)
    return params


# ---------------------------------------------------------------------------
# Pure-JAX f32 reference (mirrors the PyTorch forward in eval mode)
# ---------------------------------------------------------------------------
def _layernorm_ref(x, g, b, eps=1e-5):
    mean = jnp.mean(x, axis=-1, keepdims=True)
    var = jnp.mean((x - mean) ** 2, axis=-1, keepdims=True)
    return (x - mean) / jnp.sqrt(var + eps) * g + b


def reference_layer(x, p, num_heads, act, eps=1e-5):
    S, B, D = x.shape
    hd = D // num_heads
    qkv = x @ p["wqkv"].T + p["bqkv"]
    q, k, v = jnp.split(qkv, 3, axis=-1)

    def heads(t):  # (S, B, D) -> (B, nh, S, hd)
        return t.reshape(S, B, num_heads, hd).transpose(1, 2, 0, 3)

    qh, kh, vh = heads(q), heads(k), heads(v)
    scores = jnp.einsum("bhqd,bhkd->bhqk", qh, kh) / math.sqrt(hd)
    pattn = jax.nn.softmax(scores, axis=-1)
    o = jnp.einsum("bhqk,bhkd->bhqd", pattn, vh)
    o = o.transpose(2, 0, 1, 3).reshape(S, B, D)
    attn = o @ p["wout"].T + p["bout"]

    x = _layernorm_ref(x + attn, p["ln1_g"], p["ln1_b"], eps)
    h = x
    for i, (w, b) in enumerate(p["ffn"]):
        h = h @ w.T + b
        if i < len(p["ffn"]) - 1:
            h = act(h)
    x = _layernorm_ref(x + h, p["ln2_g"], p["ln2_b"], eps)
    return x


def reference_encoder(x, all_params, num_heads, activation_fn):
    act = _activation(activation_fn)
    for p in all_params:
        x = reference_layer(x, p, num_heads, act)
    return x


# ---------------------------------------------------------------------------
if __name__ == "__main__":
    SEQ, BATCH, DIM = 8, 2, 32
    NUM_HEADS = 4
    HIDDEN_DIMS = [64]
    NUM_LAYERS = 2
    ACT = "relu"

    key = jax.random.PRNGKey(0)
    key, kx = jax.random.split(key)
    x = jax.random.normal(kx, (SEQ, BATCH, DIM), jnp.float32)   # PyTorch MHA layout (S, B, D)

    params = init_encoder_params(key, DIM, HIDDEN_DIMS, NUM_LAYERS)

    out = transformer_encoder_pallas(x, params, NUM_HEADS, ACT)
    out = jax.block_until_ready(out)

    ref = reference_encoder(x, params, NUM_HEADS, ACT)
    assert out.shape == ref.shape == (SEQ, BATCH, DIM)
    err = float(jnp.max(jnp.abs(out - ref)))
    # bf16 MXU operands + EUP approx reciprocal across 2 layers => looser tolerance
    assert err < 4e-2, f"Pallas output mismatch vs JAX reference (max abs err {err})"
    print("KERNEL_OK")
</pallas_src>

<mosaic_0001>
module attributes {stable_mosaic.version = 11 : i64} {
  func.func @kernel(%arg0: i32, %arg1: i32, %arg2: memref<1x8x32xf32, #tpu.memory_space<vmem>>, %arg3: memref<1x32x96xbf16, #tpu.memory_space<vmem>>, %arg4: memref<1x1x96xf32, #tpu.memory_space<vmem>>, %arg5: memref<1x32x32xbf16, #tpu.memory_space<vmem>>, %arg6: memref<1x1x32xf32, #tpu.memory_space<vmem>>, %arg7: memref<1x1x32xf32, #tpu.memory_space<vmem>>, %arg8: memref<1x1x32xf32, #tpu.memory_space<vmem>>, %arg9: memref<1x32x64xbf16, #tpu.memory_space<vmem>>, %arg10: memref<1x1x64xf32, #tpu.memory_space<vmem>>, %arg11: memref<1x64x32xbf16, #tpu.memory_space<vmem>>, %arg12: memref<1x1x32xf32, #tpu.memory_space<vmem>>, %arg13: memref<1x1x32xf32, #tpu.memory_space<vmem>>, %arg14: memref<1x1x32xf32, #tpu.memory_space<vmem>>, %arg15: memref<1x8x32xf32, #tpu.memory_space<vmem>>) attributes {dimension_semantics = [#tpu.dimension_semantics<parallel>, #tpu.dimension_semantics<arbitrary>], iteration_bounds = array<i64: 2, 2>, scalar_prefetch = 0 : i64, scratch_operands = 0 : i64, tpu.core_type = #tpu.core_type<tc>, window_params = [{transform_indices = @transform_0, window_bounds = array<i64: 1, 8, 32>}, {transform_indices = @transform_1, window_bounds = array<i64: 1, 32, 96>}, {transform_indices = @transform_2, window_bounds = array<i64: 1, 1, 96>}, {transform_indices = @transform_3, window_bounds = array<i64: 1, 32, 32>}, {transform_indices = @transform_4, window_bounds = array<i64: 1, 1, 32>}, {transform_indices = @transform_5, window_bounds = array<i64: 1, 1, 32>}, {transform_indices = @transform_6, window_bounds = array<i64: 1, 1, 32>}, {transform_indices = @transform_7, window_bounds = array<i64: 1, 32, 64>}, {transform_indices = @transform_8, window_bounds = array<i64: 1, 1, 64>}, {transform_indices = @transform_9, window_bounds = array<i64: 1, 64, 32>}, {transform_indices = @transform_10, window_bounds = array<i64: 1, 1, 32>}, {transform_indices = @transform_11, window_bounds = array<i64: 1, 1, 32>}, {transform_indices = @transform_12, window_bounds = array<i64: 1, 1, 32>}, {transform_indices = @transform_13, window_bounds = array<i64: 1, 8, 32>}]} {
    %c0_i32 = arith.constant 0 : i32
    %0 = arith.cmpi eq, %arg1, %c0_i32 : i32
    %1 = arith.extui %0 : i1 to i32
    %c0_i32_0 = arith.constant 0 : i32
    %2 = arith.cmpi ne, %1, %c0_i32_0 : i32
    scf.if %2 {
      %c0_60 = arith.constant 0 : index
      %c0_61 = arith.constant 0 : index
      %c0_62 = arith.constant 0 : index
      %123 = vector.load %arg2[%c0_60, %c0_61, %c0_62] : memref<1x8x32xf32, #tpu.memory_space<vmem>>, vector<1x8x32xf32>
      %c0_63 = arith.constant 0 : index
      %c0_64 = arith.constant 0 : index
      %c0_65 = arith.constant 0 : index
      %124 = vector.load %arg15[%c0_63, %c0_64, %c0_65] : memref<1x8x32xf32, #tpu.memory_space<vmem>>, vector<1x8x32xf32>
      tpu.vector_store %arg15[%c0_63, %c0_64, %c0_65], %123 {strides = array<i32>} : memref<1x8x32xf32, #tpu.memory_space<vmem>>, vector<1x8x32xf32>,
    } else {
    }
    %c0 = arith.constant 0 : index
    %c0_1 = arith.constant 0 : index
    %c0_2 = arith.constant 0 : index
    %3 = vector.load %arg15[%c0, %c0_1, %c0_2] : memref<1x8x32xf32, #tpu.memory_space<vmem>>, vector<1x8x32xf32>
    %4 = vector.shape_cast %3 : vector<1x8x32xf32> to vector<8x32xf32>
    %5 = arith.truncf %4 : vector<8x32xf32> to vector<8x32xbf16>
    %c0_3 = arith.constant 0 : index
    %c0_4 = arith.constant 0 : index
    %c0_5 = arith.constant 0 : index
    %6 = vector.load %arg3[%c0_3, %c0_4, %c0_5] : memref<1x32x96xbf16, #tpu.memory_space<vmem>>, vector<1x32x96xbf16>
    %7 = vector.shape_cast %6 : vector<1x32x96xbf16> to vector<32x96xbf16>
    %cst = arith.constant dense<0.000000e+00> : vector<8x96xf32>
    %8 = tpu.matmul %5, %7, %cst {dimension_numbers = #tpu.dot_dimension_numbers<[1], [0], [0], [1], [0, 0, 1, 1], [], []>} : vector<8x32xbf16>, vector<32x96xbf16>, vector<8x96xf32> -> vector<8x96xf32>
    %c0_6 = arith.constant 0 : index
    %c0_7 = arith.constant 0 : index
    %c0_8 = arith.constant 0 : index
    %9 = vector.load %arg4[%c0_6, %c0_7, %c0_8] : memref<1x1x96xf32, #tpu.memory_space<vmem>>, vector<1x1x96xf32>
    %10 = vector.shape_cast %9 : vector<1x1x96xf32> to vector<1x96xf32>
    %11 = vector.broadcast %10 : vector<1x96xf32> to vector<8x96xf32>
    %12 = arith.addf %8, %11 : vector<8x96xf32>
    %13 = vector.shape_cast %12 : vector<8x96xf32> to vector<1x8x96xf32>
    %14 = tpu.transpose %13, [0, 2, 1] : vector<1x8x96xf32> -> vector<1x96x8xf32>
    %15 = vector.extract_strided_slice %14 {offsets = [0, 0, 0], sizes = [1, 32, 8], strides = [1, 1, 1]} : vector<1x96x8xf32> to vector<1x32x8xf32>
    %16 = vector.shape_cast %15 : vector<1x32x8xf32> to vector<4x8x8xf32>
    %17 = vector.extract_strided_slice %14 {offsets = [0, 32, 0], sizes = [1, 32, 8], strides = [1, 1, 1]} : vector<1x96x8xf32> to vector<1x32x8xf32>
    %18 = vector.shape_cast %17 : vector<1x32x8xf32> to vector<4x8x8xf32>
    %19 = vector.extract_strided_slice %14 {offsets = [0, 64, 0], sizes = [1, 32, 8], strides = [1, 1, 1]} : vector<1x96x8xf32> to vector<1x32x8xf32>
    %20 = vector.shape_cast %19 : vector<1x32x8xf32> to vector<4x8x8xf32>
    %21 = tpu.transpose %16, [0, 2, 1] : vector<4x8x8xf32> -> vector<4x8x8xf32>
    %22 = arith.truncf %21 : vector<4x8x8xf32> to vector<4x8x8xbf16>
    %23 = arith.truncf %18 : vector<4x8x8xf32> to vector<4x8x8xbf16>
    %24 = arith.truncf %20 : vector<4x8x8xf32> to vector<4x8x8xbf16>
    "tpu.trace_start"() <{level = 10 : i32, message = "bqd,bdk->bqk"}> : () -> ()
    %cst_9 = arith.constant dense<0.000000e+00> : vector<4x8x8xf32>
    %25 = tpu.matmul %22, %23, %cst_9 {dimension_numbers = #tpu.dot_dimension_numbers<[2], [1], [1], [2], [0, 0, 0, 1, 1, 2], [0], [0]>} : vector<4x8x8xbf16>, vector<4x8x8xbf16>, vector<4x8x8xf32> -> vector<4x8x8xf32>
    "tpu.trace_stop"() : () -> ()
    %cst_10 = arith.constant dense<0xFF800000> : vector<4x8xf32>
    %26 = vector.multi_reduction <maximumf>, %25, %cst_10 [2] : vector<4x8x8xf32> to vector<4x8xf32>
    %27 = vector.shape_cast %26 : vector<4x8xf32> to vector<4x8x1xf32>
    %28 = vector.broadcast %27 : vector<4x8x1xf32> to vector<4x8x8xf32>
    %29 = arith.subf %25, %28 : vector<4x8x8xf32>
    %30 = math.exp %29 : vector<4x8x8xf32>
    %cst_11 = arith.constant dense<0.000000e+00> : vector<4x8xf32>
    %31 = vector.multi_reduction <add>, %30, %cst_11 [2] : vector<4x8x8xf32> to vector<4x8xf32>
    %32 = vector.shape_cast %31 : vector<4x8xf32> to vector<4x8x1xf32>
    %33 = tpu.reciprocal %32 {approx = true} : vector<4x8x1xf32> -> vector<4x8x1xf32>
    %34 = vector.broadcast %33 : vector<4x8x1xf32> to vector<4x8x8xf32>
    %35 = arith.mulf %30, %34 : vector<4x8x8xf32>
    %36 = arith.truncf %35 : vector<4x8x8xf32> to vector<4x8x8xbf16>
    "tpu.trace_start"() <{level = 10 : i32, message = "bdk,bqk->bdq"}> : () -> ()
    %cst_12 = arith.constant dense<0.000000e+00> : vector<4x8x8xf32>
    %37 = tpu.matmul %24, %36, %cst_12 {dimension_numbers = #tpu.dot_dimension_numbers<[2], [2], [1], [1], [0, 0, 0, 1, 1, 1], [0], [0]>} : vector<4x8x8xbf16>, vector<4x8x8xbf16>, vector<4x8x8xf32> -> vector<4x8x8xf32>
    "tpu.trace_stop"() : () -> ()
    %38 = vector.shape_cast %37 : vector<4x8x8xf32> to vector<1x32x8xf32>
    %39 = tpu.transpose %38, [0, 2, 1] : vector<1x32x8xf32> -> vector<1x8x32xf32>
    %40 = vector.shape_cast %39 : vector<1x8x32xf32> to vector<8x32xf32>
    %41 = arith.truncf %40 : vector<8x32xf32> to vector<8x32xbf16>
    %c0_13 = arith.constant 0 : index
    %c0_14 = arith.constant 0 : index
    %c0_15 = arith.constant 0 : index
    %42 = vector.load %arg5[%c0_13, %c0_14, %c0_15] : memref<1x32x32xbf16, #tpu.memory_space<vmem>>, vector<1x32x32xbf16>
    %43 = vector.shape_cast %42 : vector<1x32x32xbf16> to vector<32x32xbf16>
    %cst_16 = arith.constant dense<0.000000e+00> : vector<8x32xf32>
    %44 = tpu.matmul %41, %43, %cst_16 {dimension_numbers = #tpu.dot_dimension_numbers<[1], [0], [0], [1], [0, 0, 1, 1], [], []>} : vector<8x32xbf16>, vector<32x32xbf16>, vector<8x32xf32> -> vector<8x32xf32>
    %c0_17 = arith.constant 0 : index
    %c0_18 = arith.constant 0 : index
    %c0_19 = arith.constant 0 : index
    %45 = vector.load %arg6[%c0_17, %c0_18, %c0_19] : memref<1x1x32xf32, #tpu.memory_space<vmem>>, vector<1x1x32xf32>
    %46 = vector.shape_cast %45 : vector<1x1x32xf32> to vector<1x32xf32>
    %47 = vector.broadcast %46 : vector<1x32xf32> to vector<8x32xf32>
    %48 = arith.addf %44, %47 : vector<8x32xf32>
    %49 = arith.addf %4, %48 : vector<8x32xf32>
    %c0_20 = arith.constant 0 : index
    %c0_21 = arith.constant 0 : index
    %c0_22 = arith.constant 0 : index
    %50 = vector.load %arg7[%c0_20, %c0_21, %c0_22] : memref<1x1x32xf32, #tpu.memory_space<vmem>>, vector<1x1x32xf32>
    %51 = vector.shape_cast %50 : vector<1x1x32xf32> to vector<1x32xf32>
    %c0_23 = arith.constant 0 : index
    %c0_24 = arith.constant 0 : index
    %c0_25 = arith.constant 0 : index
    %52 = vector.load %arg8[%c0_23, %c0_24, %c0_25] : memref<1x1x32xf32, #tpu.memory_space<vmem>>, vector<1x1x32xf32>
    %53 = vector.shape_cast %52 : vector<1x1x32xf32> to vector<1x32xf32>
    %cst_26 = arith.constant dense<0.000000e+00> : vector<8xf32>
    %54 = vector.multi_reduction <add>, %49, %cst_26 [1] : vector<8x32xf32> to vector<8xf32>
    %55 = vector.shape_cast %54 : vector<8xf32> to vector<8x1xf32>
    %cst_27 = arith.constant 3.200000e+01 : f32
    %56 = vector.broadcast %cst_27 : f32 to vector<8x1xf32>
    %57 = arith.divf %55, %56 : vector<8x1xf32>
    %58 = arith.mulf %49, %49 : vector<8x32xf32>
    %cst_28 = arith.constant dense<0.000000e+00> : vector<8xf32>
    %59 = vector.multi_reduction <add>, %58, %cst_28 [1] : vector<8x32xf32> to vector<8xf32>
    %60 = vector.shape_cast %59 : vector<8xf32> to vector<8x1xf32>
    %cst_29 = arith.constant 3.200000e+01 : f32
    %61 = vector.broadcast %cst_29 : f32 to vector<8x1xf32>
    %62 = arith.divf %60, %61 : vector<8x1xf32>
    %63 = arith.mulf %57, %57 : vector<8x1xf32>
    %64 = arith.subf %62, %63 : vector<8x1xf32>
    %65 = vector.broadcast %57 : vector<8x1xf32> to vector<8x32xf32>
    %66 = arith.subf %49, %65 : vector<8x32xf32>
    %cst_30 = arith.constant 9.99999974E-6 : f32
    %67 = vector.broadcast %cst_30 : f32 to vector<8x1xf32>
    %68 = arith.addf %64, %67 : vector<8x1xf32>
    %69 = math.rsqrt %68 : vector<8x1xf32>
    %70 = vector.broadcast %69 : vector<8x1xf32> to vector<8x32xf32>
    %71 = arith.mulf %66, %70 : vector<8x32xf32>
    %72 = vector.broadcast %51 : vector<1x32xf32> to vector<8x32xf32>
    %73 = arith.mulf %71, %72 : vector<8x32xf32>
    %74 = vector.broadcast %53 : vector<1x32xf32> to vector<8x32xf32>
    %75 = arith.addf %73, %74 : vector<8x32xf32>
    %c0_31 = arith.constant 0 : index
    %c0_32 = arith.constant 0 : index
    %c0_33 = arith.constant 0 : index
    %76 = vector.load %arg9[%c0_31, %c0_32, %c0_33] : memref<1x32x64xbf16, #tpu.memory_space<vmem>>, vector<1x32x64xbf16>
    %77 = vector.shape_cast %76 : vector<1x32x64xbf16> to vector<32x64xbf16>
    %c0_34 = arith.constant 0 : index
    %c0_35 = arith.constant 0 : index
    %c0_36 = arith.constant 0 : index
    %78 = vector.load %arg10[%c0_34, %c0_35, %c0_36] : memref<1x1x64xf32, #tpu.memory_space<vmem>>, vector<1x1x64xf32>
    %79 = vector.shape_cast %78 : vector<1x1x64xf32> to vector<1x64xf32>
    %80 = arith.truncf %75 : vector<8x32xf32> to vector<8x32xbf16>
    %cst_37 = arith.constant dense<0.000000e+00> : vector<8x64xf32>
    %81 = tpu.matmul %80, %77, %cst_37 {dimension_numbers = #tpu.dot_dimension_numbers<[1], [0], [0], [1], [0, 0, 1, 1], [], []>} : vector<8x32xbf16>, vector<32x64xbf16>, vector<8x64xf32> -> vector<8x64xf32>
    %82 = vector.broadcast %79 : vector<1x64xf32> to vector<8x64xf32>
    %83 = arith.addf %81, %82 : vector<8x64xf32>
    %cst_38 = arith.constant 0.000000e+00 : f32
    %84 = vector.broadcast %cst_38 : f32 to vector<8x64xf32>
    %85 = arith.maximumf %83, %84 : vector<8x64xf32>
    %c0_39 = arith.constant 0 : index
    %c0_40 = arith.constant 0 : index
    %c0_41 = arith.constant 0 : index
    %86 = vector.load %arg11[%c0_39, %c0_40, %c0_41] : memref<1x64x32xbf16, #tpu.memory_space<vmem>>, vector<1x64x32xbf16>
    %87 = vector.shape_cast %86 : vector<1x64x32xbf16> to vector<64x32xbf16>
    %c0_42 = arith.constant 0 : index
    %c0_43 = arith.constant 0 : index
    %c0_44 = arith.constant 0 : index
    %88 = vector.load %arg12[%c0_42, %c0_43, %c0_44] : memref<1x1x32xf32, #tpu.memory_space<vmem>>, vector<1x1x32xf32>
    %89 = vector.shape_cast %88 : vector<1x1x32xf32> to vector<1x32xf32>
    %90 = arith.truncf %85 : vector<8x64xf32> to vector<8x64xbf16>
    %cst_45 = arith.constant dense<0.000000e+00> : vector<8x32xf32>
    %91 = tpu.matmul %90, %87, %cst_45 {dimension_numbers = #tpu.dot_dimension_numbers<[1], [0], [0], [1], [0, 0, 1, 1], [], []>} : vector<8x64xbf16>, vector<64x32xbf16>, vector<8x32xf32> -> vector<8x32xf32>
    %92 = vector.broadcast %89 : vector<1x32xf32> to vector<8x32xf32>
    %93 = arith.addf %91, %92 : vector<8x32xf32>
    %94 = arith.addf %75, %93 : vector<8x32xf32>
    %c0_46 = arith.constant 0 : index
    %c0_47 = arith.constant 0 : index
    %c0_48 = arith.constant 0 : index
    %95 = vector.load %arg13[%c0_46, %c0_47, %c0_48] : memref<1x1x32xf32, #tpu.memory_space<vmem>>, vector<1x1x32xf32>
    %96 = vector.shape_cast %95 : vector<1x1x32xf32> to vector<1x32xf32>
    %c0_49 = arith.constant 0 : index
    %c0_50 = arith.constant 0 : index
    %c0_51 = arith.constant 0 : index
    %97 = vector.load %arg14[%c0_49, %c0_50, %c0_51] : memref<1x1x32xf32, #tpu.memory_space<vmem>>, vector<1x1x32xf32>
    %98 = vector.shape_cast %97 : vector<1x1x32xf32> to vector<1x32xf32>
    %cst_52 = arith.constant dense<0.000000e+00> : vector<8xf32>
    %99 = vector.multi_reduction <add>, %94, %cst_52 [1] : vector<8x32xf32> to vector<8xf32>
    %100 = vector.shape_cast %99 : vector<8xf32> to vector<8x1xf32>
    %cst_53 = arith.constant 3.200000e+01 : f32
    %101 = vector.broadcast %cst_53 : f32 to vector<8x1xf32>
    %102 = arith.divf %100, %101 : vector<8x1xf32>
    %103 = arith.mulf %94, %94 : vector<8x32xf32>
    %cst_54 = arith.constant dense<0.000000e+00> : vector<8xf32>
    %104 = vector.multi_reduction <add>, %103, %cst_54 [1] : vector<8x32xf32> to vector<8xf32>
    %105 = vector.shape_cast %104 : vector<8xf32> to vector<8x1xf32>
    %cst_55 = arith.constant 3.200000e+01 : f32
    %106 = vector.broadcast %cst_55 : f32 to vector<8x1xf32>
    %107 = arith.divf %105, %106 : vector<8x1xf32>
    %108 = arith.mulf %102, %102 : vector<8x1xf32>
    %109 = arith.subf %107, %108 : vector<8x1xf32>
    %110 = vector.broadcast %102 : vector<8x1xf32> to vector<8x32xf32>
    %111 = arith.subf %94, %110 : vector<8x32xf32>
    %cst_56 = arith.constant 9.99999974E-6 : f32
    %112 = vector.broadcast %cst_56 : f32 to vector<8x1xf32>
    %113 = arith.addf %109, %112 : vector<8x1xf32>
    %114 = math.rsqrt %113 : vector<8x1xf32>
    %115 = vector.broadcast %114 : vector<8x1xf32> to vector<8x32xf32>
    %116 = arith.mulf %111, %115 : vector<8x32xf32>
    %117 = vector.broadcast %96 : vector<1x32xf32> to vector<8x32xf32>
    %118 = arith.mulf %116, %117 : vector<8x32xf32>
    %119 = vector.broadcast %98 : vector<1x32xf32> to vector<8x32xf32>
    %120 = arith.addf %118, %119 : vector<8x32xf32>
    %121 = vector.shape_cast %120 : vector<8x32xf32> to vector<1x8x32xf32>
    %c0_57 = arith.constant 0 : index
    %c0_58 = arith.constant 0 : index
    %c0_59 = arith.constant 0 : index
    %122 = vector.load %arg15[%c0_57, %c0_58, %c0_59] : memref<1x8x32xf32, #tpu.memory_space<vmem>>, vector<1x8x32xf32>
    tpu.vector_store %arg15[%c0_57, %c0_58, %c0_59], %121 {strides = array<i32>} : memref<1x8x32xf32, #tpu.memory_space<vmem>>, vector<1x8x32xf32>,
    return
  }
  func.func @transform_0(%arg0: i32, %arg1: i32) -> (i32, i32, i32) {
    %c0_i32 = arith.constant 0 : i32
    %c0_i32_0 = arith.constant 0 : i32
    %c0_i32_1 = arith.constant 0 : i32
    return %arg0, %c0_i32, %c0_i32_0 : i32, i32, i32
  }
  func.func @transform_1(%arg0: i32, %arg1: i32) -> (i32, i32, i32) {
    %c0_i32 = arith.constant 0 : i32
    %c0_i32_0 = arith.constant 0 : i32
    %c0_i32_1 = arith.constant 0 : i32
    return %arg1, %c0_i32, %c0_i32_0 : i32, i32, i32
  }
  func.func @transform_2(%arg0: i32, %arg1: i32) -> (i32, i32, i32) {
    %c0_i32 = arith.constant 0 : i32
    %c0_i32_0 = arith.constant 0 : i32
    %c0_i32_1 = arith.constant 0 : i32
    return %arg1, %c0_i32, %c0_i32_0 : i32, i32, i32
  }
  func.func @transform_3(%arg0: i32, %arg1: i32) -> (i32, i32, i32) {
    %c0_i32 = arith.constant 0 : i32
    %c0_i32_0 = arith.constant 0 : i32
    %c0_i32_1 = arith.constant 0 : i32
    return %arg1, %c0_i32, %c0_i32_0 : i32, i32, i32
  }
  func.func @transform_4(%arg0: i32, %arg1: i32) -> (i32, i32, i32) {
    %c0_i32 = arith.constant 0 : i32
    %c0_i32_0 = arith.constant 0 : i32
    %c0_i32_1 = arith.constant 0 : i32
    return %arg1, %c0_i32, %c0_i32_0 : i32, i32, i32
  }
  func.func @transform_5(%arg0: i32, %arg1: i32) -> (i32, i32, i32) {
    %c0_i32 = arith.constant 0 : i32
    %c0_i32_0 = arith.constant 0 : i32
    %c0_i32_1 = arith.constant 0 : i32
    return %arg1, %c0_i32, %c0_i32_0 : i32, i32, i32
  }
  func.func @transform_6(%arg0: i32, %arg1: i32) -> (i32, i32, i32) {
    %c0_i32 = arith.constant 0 : i32
    %c0_i32_0 = arith.constant 0 : i32
    %c0_i32_1 = arith.constant 0 : i32
    return %arg1, %c0_i32, %c0_i32_0 : i32, i32, i32
  }
  func.func @transform_7(%arg0: i32, %arg1: i32) -> (i32, i32, i32) {
    %c0_i32 = arith.constant 0 : i32
    %c0_i32_0 = arith.constant 0 : i32
    %c0_i32_1 = arith.constant 0 : i32
    return %arg1, %c0_i32, %c0_i32_0 : i32, i32, i32
  }
  func.func @transform_8(%arg0: i32, %arg1: i32) -> (i32, i32, i32) {
    %c0_i32 = arith.constant 0 : i32
    %c0_i32_0 = arith.constant 0 : i32
    %c0_i32_1 = arith.constant 0 : i32
    return %arg1, %c0_i32, %c0_i32_0 : i32, i32, i32
  }
  func.func @transform_9(%arg0: i32, %arg1: i32) -> (i32, i32, i32) {
    %c0_i32 = arith.constant 0 : i32
    %c0_i32_0 = arith.constant 0 : i32
    %c0_i32_1 = arith.constant 0 : i32
    return %arg1, %c0_i32, %c0_i32_0 : i32, i32, i32
  }
  func.func @transform_10(%arg0: i32, %arg1: i32) -> (i32, i32, i32) {
    %c0_i32 = arith.constant 0 : i32
    %c0_i32_0 = arith.constant 0 : i32
    %c0_i32_1 = arith.constant 0 : i32
    return %arg1, %c0_i32, %c0_i32_0 : i32, i32, i32
  }
  func.func @transform_11(%arg0: i32, %arg1: i32) -> (i32, i32, i32) {
    %c0_i32 = arith.constant 0 : i32
    %c0_i32_0 = arith.constant 0 : i32
    %c0_i32_1 = arith.constant 0 : i32
    return %arg1, %c0_i32, %c0_i32_0 : i32, i32, i32
  }
  func.func @transform_12(%arg0: i32, %arg1: i32) -> (i32, i32, i32) {
    %c0_i32 = arith.constant 0 : i32
    %c0_i32_0 = arith.constant 0 : i32
    %c0_i32_1 = arith.constant 0 : i32
    return %arg1, %c0_i32, %c0_i32_0 : i32, i32, i32
  }
  func.func @transform_13(%arg0: i32, %arg1: i32) -> (i32, i32, i32) {
    %c0_i32 = arith.constant 0 : i32
    %c0_i32_0 = arith.constant 0 : i32
    %c0_i32_1 = arith.constant 0 : i32
    return %arg0, %c0_i32, %c0_i32_0 : i32, i32, i32
  }
}

</mosaic_0001>

<bundles_post_ra>
// kernel: tpu_custom_call.1
= control target key start
LH: loop header
LB: loop body
LE: loop exit
PB: predicated region body
PF: predicated region fallthrough
CT: control target
= control target key end

     0   :  { %s2697_s0 = inlined_call_operand.hbm [shape: f32[2,8,32], index: 0, kind: input, shape index: {}]   ;;  %s2698_s1 = inlined_call_operand.vmem [shape: bf16[2,32,96], index: 1, kind: input, shape index: {}]   ;;  %s2699_s2 = inlined_call_operand.vmem [shape: f32[2,1,96], index: 2, kind: input, shape index: {}]   ;;  %s2700_s3 = inlined_call_operand.vmem [shape: bf16[2,32,32], index: 3, kind: input, shape index: {}]   ;;  %s2701_s4 = inlined_call_operand.vmem [shape: f32[2,1,32], index: 4, kind: input, shape index: {}]   ;;  %s2702_s5 = inlined_call_operand.vmem [shape: f32[2,1,32], index: 5, kind: input, shape index: {}]   ;;  %s2703_s6 = inlined_call_operand.vmem [shape: f32[2,1,32], index: 6, kind: input, shape index: {}]   ;;  %s2704_s7 = inlined_call_operand.vmem [shape: bf16[2,32,64], index: 7, kind: input, shape index: {}]   ;;  %s2705_s8 = inlined_call_operand.vmem [shape: f32[2,1,64], index: 8, kind: input, shape index: {}]   ;;  %s2706_s9 = inlined_call_operand.vmem [shape: bf16[2,64,32], index: 9, kind: input, shape index: {}]   ;;  %s2707_s10 = inlined_call_operand.vmem [shape: f32[2,1,32], index: 10, kind: input, shape index: {}]   ;;  %s2708_s11 = inlined_call_operand.vmem [shape: f32[2,1,32], index: 11, kind: input, shape index: {}]   ;;  %s2709_s12 = inlined_call_operand.vmem [shape: f32[2,1,32], index: 12, kind: input, shape index: {}]   ;;  %s2710_s13 = inlined_call_operand.hbm [shape: f32[2,8,32], index: 13, kind: output, shape index: {}]  }
   0x1   :  { %2724 = sst [smem:[#allocation21_spill]] %s2697_s0 }
   0x2   :  { %2725 = sst [smem:[#allocation22_spill]] %s2698_s1 }
   0x3   :  { %2726 = sst [smem:[#allocation23_spill]] %s2700_s3 }
   0x4   :  { %2727 = sst [smem:[#allocation24_spill]] %s2703_s6 }
   0x5   :  { %2728 = sst [smem:[#allocation25_spill]] %s2704_s7 }
   0x6   :  { %2729 = sst [smem:[#allocation26_spill]] %s2707_s10 }
   0x7   :  { %2730 = sst [smem:[#allocation27_spill]] %s2708_s11 }
   0x8   :  { %2731 = sst [smem:[#allocation28_spill]] %s2709_s12 }
   0x9   :  { %2732 = sst [smem:[#allocation29_spill]] %s2710_s13 }
   0xa   :  { %18 = vsyncpa [#allocation3], 0 }
   0xb   :  { %20 = vsyncpa [#allocation3 + $0x1], 0 }
   0xc   :  { %21 = vsyncpa [#allocation4], 0 }
   0xd   :  { %23 = vsyncpa [#allocation4 + $0x1], 0  ;;  %s2339_s25 = smov 0   ;;  %s2341_s26 = smov 0  }
   0xe   :  { %s2343_s27 = smov 0   ;;  %s2345_s28 = smov 0  }
   0xf   :  { %s2347_s29 = smov 0   ;;  %s2349_s30 = smov 0  }
  0x10   :  { %s2351_s14 = smov 0   ;;  %s2353_s15 = smov 0  }
  0x11 LB: > { %2733 = sst [smem:[#allocation8_spill]] %s2235_s25  ;;  %s1859_s16 = sadd.s32 4294967295, %s2263_s15   ;;  %s2263_s15 = sphi %s2353_s15, %s29_s15   ;;  %s2259_s14 = sphi %s2351_s14, %s2781_s14   ;;  %s2255_s30 = sphi %s2349_s30, %s2780_s30   ;;  %s2251_s29 = sphi %s2347_s29, %s2779_s29   ;;  %s2247_s28 = sphi %s2345_s28, %s2778_s28   ;;  %s2243_s27 = sphi %s2343_s27, %s2777_s27   ;;  %s2239_s26 = sphi %s2341_s26, %s2776_s26   ;;  %s2235_s25 = sphi %s2339_s25, %s2775_s25  }
  0x12   : > { %2734 = sst [smem:[#allocation9_spill]] %s2239_s26  ;;  %s1860_s17 = sadd.s32 4294967294, %s2263_s15  }
  0x13   : > { %2735 = sst [smem:[#allocation10_spill]] %s2243_s27  ;;  %s38_s18 = sadd.s32 1, %s2255_s30 }
  0x14   : > { %2736 = sst [smem:[#allocation11_spill]] %s2251_s29  ;;  %s41_s19 = sadd.s32 1, %s2259_s14 }
  0x15   : > { %2737 = sst [smem:[#allocation12_spill]] %s2255_s30  ;;  %p39_p0 = scmp.ge.s32.totalorder %s38_s18, 2 }
  0x16   : > { %2738 = sst [smem:[#allocation13_spill]] %s2259_s14  ;;  %s48_s20 = sadd.s32 1, %s2243_s27 }
  0x17   : > { %2739 = sst [smem:[#allocation14_spill]] %s2263_s15  ;;  %p55_p1 = scmp.ne.s32.totalorder %s2243_s27, %s2239_s26 }
  0x18   : > { %p56_p2 = scmp.eq.s32.totalorder %s2263_s15, 0  ;;  %s2783_s18 = smov (%p39_p0, %s38_s18), 0 }
  0x19   : > { %2740 = sst [smem:[#allocation15_spill]] %s2783_s18  ;;  %s2785_s19 = smov (!%p39_p0, %s41_s19), %s2259_s14 }
  0x1a   : > { %p2390_p3 = por %p56_p2, %p55_p1  ;;  %p61_p4 = scmp.ne.s32.totalorder %s2239_s26, %s2235_s25 }
  0x1b   : > { %p43_p5 = scmp.ge.s32.totalorder %s2785_s19, 2  ;;  %p62_p6 = scmp.eq.s32.totalorder %s1859_s16, 0 }
  0x1c   : > { %p397_p7 = scmp.eq.s32.totalorder %s1859_s16, 3  ;;  %p403_p8 = scmp.eq.s32.totalorder %s1860_s17, 3 }
  0x1d   : > { %s2787_s19 = smov (%p43_p5, %s2785_s19), 0  ;;  %p2398_p9 = por %p62_p6, %p61_p4 }
  0x1e   : > { %2742 = sst [smem:[#allocation16_spill]] %s2787_s19  ;;  %p2402_p10 = por %p397_p7, %p55_p1 }
  0x1f   : > { %s45_s24 = ssub.s32 %s2259_s14, %s2787_s19  ;;  %p2408_p11 = por %p403_p8, %p61_p4 }
  0x20   : > { %s2744_s23 = scalar_select %p2402_p10, 1, 0 }
  0x21   : > { %s2746_s18 = scalar_select %p2408_p11, 1, 0 }
  0x22   : > { %2745 = sst [smem:[#allocation17_spill]] %s2744_s23  ;;  %p46_p12 = scmp.eq.s32.totalorder %s45_s24, 0 }
  0x23   : > { %2747 = sst [smem:[#allocation18_spill]] %s2746_s18  ;;  %p2041_p13 = scmp.lt.s32.totalorder %s2263_s15, 4 }
  0x24   : > { %s423_s16 = sand.u32 1, %s2243_s27   ;;  %s1864_s25 = sshll.u32 %s2259_s14, 7 }
  0x25   : > { %s2415_s17 = scalar_select %p46_p12, %s2243_s27, %s48_s20  }
  0x26   : > { %s1863_s30 = sshll.u32 %s423_s16, 3  ;;  %s2749_s0 = sld [smem:[#allocation21_spill]] }
  0x27   : > { %2748 = sst [smem:[#allocation19_spill]] %s2415_s17  ;;  %s427_s11 = scalar_lea.vmem [#allocation2], %s1863_s30 }
  0x28   : > { %s434_s10 = sshll.u32 %s427_s11, 4  ;;  %p2423_p0 = pnand %p2041_p13, %p2390_p3  ;;  %s435_s10 = int_to_ptr.vmem [resolvable:$true] %s434_s10 }
  0x29   : > { %p1865_p1 = scmp.ge.s32.totalorder %s2263_s15, 1  ;;  %p519_p2 = scmp.lt.s32.totalorder %s2263_s15, 5 }
  0x2a   : > { %s424_s24 = scalar_lea.sflag [#allocation3], %s423_s16  ;;  %p2141_p4 = pneg %p2423_p0 }
  0x2b   : > { %s2152_s20 = scalar_lea.vmem %s435_s10, 128  ;;  %s2265_s13 = smov [#allocation2]  }
  0x2c   : > { %s432_s12 = scalar_lea.hbm %s2749_s0, %s1864_s25  ;;  %p2153_p5 = scmp.ne.s32.totalorder %s435_s10, %s2152_s20 }
  0x2d   : > { %s2157_s25 = sshll.u32 %s2265_s13, 4  ;;  %s2158_s25 = int_to_ptr.vmem [resolvable:$false] %s2157_s25 }
  0x2e   : > { %p2155_p6 = pnand %p2153_p5, %p2141_p4  ;;  %s2159_s11 = scalar_lea.vmem %s2158_s25, 256 }
  0x2f   : > { %p2160_p8 = scmp.lt.s32.totalorder %s435_s10, %s2158_s25  ;;  %p2161_p12 = scmp.lt.s32.totalorder %s2159_s11, %s2152_s20 }
  0x30   : > { %p2156_p7 = pneg %p2155_p6 }
  0x31   : > { %p2162_p3 = por %p2161_p12, %p2160_p8 }
  0x33   : > { %p2163_p13 = pnand %p2162_p3, %p2156_p7 }
  0x35   : > { %2166 = shalt.err (!%p2163_p13)
}
  0x36   : > { %2036 = dma.hbm_to_vmem [thread:$0]  (!%p2423_p0), %s432_s12, 128, %s435_s10, %s424_s24  }
  0x37   : > { %p520_p11 = pnand %p1865_p1, %p519_p2 }
  0x39   : > { %523 = sbr.rel (%p520_p11) target bundleno = 2333 (0x91d), region = 72 }
  0x3e   : > { %s2438_s29 = sand.u32 1, %s2239_s26  }
  0x3f   : > { %2751 = sst [smem:[#allocation20_spill]] %s2438_s29  ;;  %s1866_s30 = sshll.u32 %s2438_s29, 3 }
  0x40   : > { %s526_s21 = scalar_lea.sflag [#allocation3], %s2438_s29  ;;  %s529_s16 = scalar_lea.vmem [#allocation2], %s1866_s30 }
  0x41   : > { %2226 = dma.done.wait (%p2398_p9), %s526_s21, 128  }
  0x42   : > { %2228 = vsyncadd (%p2398_p9), %s526_s21, 4294967168  ;;  %p616_p0 = scmp.lt.s32.totalorder %s2247_s28, 1  ;;  %s2752_s1 = sld [smem:[#allocation22_spill]] }
  0x43   : > { %s2753_s3 = sld [smem:[#allocation23_spill]]  ;;  %s2502_s11 = scalar_lea.vmem [#allocation5], %s1866_s30 }
  0x44   : > { %s2448_s10 = scalar_select %p616_p0, %s2247_s28, 1 }
  0x45   : > { %s2755_s7 = sld [smem:[#allocation25_spill]]  ;;  %p1876_p9 = scmp.ne.s32.totalorder %s2247_s28, 0 }
  0x46   : > { %s1911_s12 = sshll.u32 %s2448_s10, 4  ;;  %s2756_s15 = sld [smem:[#allocation26_spill]] }
  0x47   : > { %s2757_s29 = sld [smem:[#allocation27_spill]] }
  0x48   : > { %s620_s25 = scalar_lea.vmem %s2752_s1, %s1911_s12  ;;  %s645_s1 = scalar_lea.vmem %s2705_s8, %s2448_s10 }
  0x49   : > { %s2461_s0 = scalar_lea.vmem %s2753_s3, %s1911_s12  ;;  %s1914_s3 = sshll.u32 %s2448_s10, 5 }
  0x4a   : > { %s2488_s27 = scalar_lea.vmem %s2706_s9, %s1914_s3 }
  0x4b   : > { %s2478_s13 = scalar_lea.vmem %s2755_s7, %s1911_s12  ;;  %s2758_s7 = sld [smem:[#allocation28_spill]] }
  0x4c   : > { %s653_s23 = scalar_lea.vmem %s2756_s15, %s2448_s10 }
  0x4d   : > { %s656_s22 = scalar_lea.vmem %s2757_s29, %s2448_s10  ;;  %664 = sbr.rel (%p1876_p9) target bundleno = 84 (0x54), region = 80 }
  0x51   : > { %s659_s6 = scalar_lea.vmem %s2758_s7, %s2448_s10 }
  0x52   : > { %v665_v0 = vld [vmem:[%s529_s16] sm:$0xff]  ;;  %vm666_vm0 = vcmask 261120  }
  0x53   : > { %667 = vst.msk [vmem:[%s2502_s11] sm:$0xff] %vm666_vm0, %v665_v0 }
  0x54 PF: > { %v2109_v1 = vld [vmem:[%s620_s25 + $0x8] sm:$0xff]   ;;  %v2266_v2 = vmov 0.0   ;;  %v2110_v3 = vld [vmem:[%s620_s25] sm:$0xff]   ;;  %vm2267_vm1 = vmmov 0   ;;  %vm693_vm2 = vcmask 261120   ;;  %s2759_s28 = scalar_lea.vmem %s2699_s2, %s2448_s10  ;;  %vm913_vm3 = vcmask 1043456   ;;  %s2760_s29 = scalar_lea.vmem %s2701_s4, %s2448_s10 }
  0x55   : > { %1945 = vmatprep.subr.bf16.mxu0 %v2266_v2  ;;  %1953 = vmatprep.subr.bf16.mxu1 %v2266_v2  ;;  %v1877_v6 = vld [vmem:[%s2759_s28] ss:$0 sm:$0xff]  ;;  %vm909_vm4 = vcmask 64512   ;;  %s2761_s25 = scalar_lea.vmem %s2702_s5, %s2448_s10  ;;  %s2762_s21 = sld [smem:[#allocation24_spill]]  ;;  %vm1567_vm5 = vcmask 523264  }
  0x56   : > { %1946 = vmatpush3.bf16.msra.mxu0 %v2109_v1  ;;  %1949 = vmatprep.mubr.msk.bf16.mxu0 %vm2267_vm1, %v2266_v2  ;;  %s1658_s30 = sshll.u32 %s2502_s11, 4  ;;  %s2770_s24 = sld [smem:[#allocation29_spill]]  ;;  %s1659_s30 = int_to_ptr.vmem [resolvable:$true] %s1658_s30 }
  0x57   : > { %1947 = vmatprep.subr.bf16.mxu0 %v2266_v2  ;;  %1955 = vmatprep.mubr.msk.bf16.mxu1 %vm2267_vm1, %v2266_v2 }
  0x5a   : > { %v2511_v4 = vld [vmem:[%s2502_s11] sm:$0xff]  ;;  %1948 = vmatpush3.bf16.msra.mxu0 %v2110_v3 }
  0x5b   : > { %v669_v5 = vpack.c.bf16 %v2511_v4, %v2511_v4  ;;  %1977 = vmatprep.subr.bf16.mxu0 %v2266_v2  ;;  %s2763_s14 = scalar_lea.vmem %s2762_s21, %s2448_s10 }
  0x5d   : > { %1950 = vmatmul.mubr.msk.bf16.vlgmr.msra.gmra.mxu0 %vm693_vm2, %v669_v5 }
  0x5e   : > { %1979 = vmatprep.mubr.msk.bf16.mxu0 %vm2267_vm1, %v2266_v2 }
 0x11d   : > { %v731_v7 = vpop.f32.mrf.mxu0 }
 0x11e   : > { %v732_v8 = vadd.f32 %v1877_v6, %v731_v7 }
 0x11f   : > { %v1951_v9 = vpop.f32.mrf.mxu0 }
 0x120   : > { %737 = vxpose.xlu0.b32.start.end [1/1] (short) (narrow) %v732_v8, 96 }
 0x121   : > { %v734_v10 = vpop.f32.mrf.mxu0 }
 0x123   : > { %v1952_v11 = vpop.f32.mrf.mxu0 }
 0x19c   : > { %v753_v12 = vpop.trf.xlu0 }
 0x19d   : > { %769 = vxpose.xlu0.b32.start.end [1/1] (short) (narrow) %v753_v12, 8 }
 0x1a0   : > { %v754_v13 = vpop.trf.xlu0 }
 0x1a1   : > { %801 = vxpose.xlu1.b32.start.end [1/1] (short) (narrow) %v754_v13, 8 }
 0x1a4   : > { %v755_v14 = vpop.trf.xlu0 }
 0x1a5   : > { %833 = vxpose.xlu1.b32.start.end [1/1] (short) (narrow) %v755_v14, 8 }
 0x1a8   : > { %v756_v15 = vpop.trf.xlu0 }
 0x1a9   : > { %865 = vxpose.xlu1.b32.start.end [1/1] (short) (narrow) %v756_v15, 8 }
 0x1ac   : > { %v757_v16 = vpop.trf.xlu0 }
 0x1ad   : > { %v901_v17 = vpack.c.bf16 %v757_v16, %v757_v16 }
 0x1af   : > { %v915_v18 = vsel %vm913_vm3, %v901_v17, 0 }
 0x1b0   : > { %1954 = vmatpush3.bf16.msra.mxu1 %v915_v18  ;;  %v758_v19 = vpop.trf.xlu0 }
 0x1b1   : > { %1959 = vmatprep.subr.bf16.mxu1 %v2266_v2  ;;  %v902_v26 = vpack.c.bf16 %v758_v19, %v758_v19 }
 0x1b3   : > { %v961_v29 = vsel %vm913_vm3, %v902_v26, 0 }
 0x1b4   : > { %v759_v20 = vpop.trf.xlu0 }
 0x1b5   : > { %v903_v31 = vpack.c.bf16 %v759_v20, %v759_v20 }
 0x1b7   : > { %v1007_v33 = vsel %vm913_vm3, %v903_v31, 0 }
 0x1b8   : > { %v760_v21 = vpop.trf.xlu0 }
 0x1b9   : > { %v904_v35 = vpack.c.bf16 %v760_v21, %v760_v21 }
 0x1bb   : > { %v1053_v37 = vsel %vm913_vm3, %v904_v35, 0 }
 0x1bc   : > { %v2529_v22 = vpop.trf.xlu0 }
 0x1c0   : > { %v2531_v23 = vpop.trf.xlu0 }
 0x1c4   : > { %v2533_v24 = vpop.trf.xlu0 }
 0x1c8   : > { %v2535_v25 = vpop.trf.xlu0 }
 0x219   : > { %v785_v27 = vpop.trf.xlu0 }
 0x21a   : > { %v897_v28 = vpack.c.bf16 %v785_v27, %v785_v27 }
 0x21c   : > { %1956 = vmatmul.mubr.msk.bf16.vlgmr.msra.gmra.mxu1 %vm909_vm4, %v897_v28 }
 0x21d   : > { %1960 = vmatpush3.bf16.msra.mxu1 %v961_v29  ;;  %v817_v30 = vpop.trf.xlu1  ;;  %1961 = vmatprep.mubr.msk.bf16.mxu1 %vm2267_vm1, %v2266_v2 }
 0x21e   : > { %1965 = vmatprep.subr.bf16.mxu1 %v2266_v2  ;;  %v898_v32 = vpack.c.bf16 %v817_v30, %v817_v30 }
 0x221   : > { %v849_v34 = vpop.trf.xlu1 }
 0x222   : > { %v899_v36 = vpack.c.bf16 %v849_v34, %v849_v34 }
 0x224   : > { %1962 = vmatmul.mubr.msk.bf16.vlgmr.msra.gmra.mxu1 %vm909_vm4, %v898_v32  ;;  %v905_v32 = vpack.c.bf16 %v2529_v22, %v2529_v22 }
 0x225   : > { %1966 = vmatpush3.bf16.msra.mxu1 %v1007_v33  ;;  %1967 = vmatprep.mubr.msk.bf16.mxu1 %vm2267_vm1, %v2266_v2  ;;  %v881_v38 = vpop.trf.xlu1 }
 0x226   : > { %1971 = vmatprep.subr.bf16.mxu1 %v2266_v2  ;;  %v900_v39 = vpack.c.bf16 %v881_v38, %v881_v38 }
 0x22c   : > { %1968 = vmatmul.mubr.msk.bf16.vlgmr.msra.gmra.mxu1 %vm909_vm4, %v899_v36 }
 0x22d   : > { %1972 = vmatpush3.bf16.msra.mxu1 %v1053_v37  ;;  %1973 = vmatprep.mubr.msk.bf16.mxu1 %vm2267_vm1, %v2266_v2  ;;  %v906_v37 = vpack.c.bf16 %v2531_v23, %v2531_v23 }
 0x22e   : > { %1983 = vmatprep.subr.bf16.mxu1 %v2266_v2 }
 0x234   : > { %1974 = vmatmul.mubr.msk.bf16.vlgmr.msra.gmra.mxu1 %vm909_vm4, %v900_v39 }
 0x235   : > { %1985 = vmatprep.mubr.msk.bf16.mxu1 %vm2267_vm1, %v2266_v2 }
 0x2dc   : > { %v951_v40 = vpop.f32.mrf.mxu1 }
 0x2dd   : > { %v1095_v41 = vsel %vm909_vm4, %v951_v40, -inf }
 0x2de   : > { %1096 = vmax.xlane.f32.xlu1 %v1095_v41  ;;  %v1957_v42 = vpop.f32.mrf.mxu1  ;;  %v907_v41 = vpack.c.bf16 %v2533_v24, %v2533_v24  ;;  %v2111_v24 = vld [vmem:[%s2461_s0 + $0x8] sm:$0xff]  }
 0x2e0   : > { %v954_v43 = vpop.f32.mrf.mxu1 }
 0x2e1   : > { %v908_v43 = vpack.c.bf16 %v2535_v25, %v2535_v25 }
 0x2e2   : > { %v1958_v44 = vpop.f32.mrf.mxu1 }
 0x2e3   : > { %v2112_v44 = vld [vmem:[%s2461_s0] sm:$0xff]  }
 0x2e4   : > { %v997_v45 = vpop.f32.mrf.mxu1 }
 0x2e5   : > { %v1098_v46 = vsel %vm909_vm4, %v997_v45, -inf }
 0x2e6   : > { %1099 = vmax.xlane.f32.xlu0 %v1098_v46  ;;  %v1963_v47 = vpop.f32.mrf.mxu1 }
 0x2e8   : > { %v1000_v48 = vpop.f32.mrf.mxu1 }
 0x2ea   : > { %v1964_v49 = vpop.f32.mrf.mxu1 }
 0x2ec   : > { %v1043_v50 = vpop.f32.mrf.mxu1 }
 0x2ed   : > { %v1101_v51 = vsel %vm909_vm4, %v1043_v50, -inf }
 0x2ee   : > { %1102 = vmax.xlane.f32.xlu1 %v1101_v51  ;;  %v1969_v52 = vpop.f32.mrf.mxu1 }
 0x2f0   : > { %v1046_v53 = vpop.f32.mrf.mxu1 }
 0x2f2   : > { %v1970_v54 = vpop.f32.mrf.mxu1 }
 0x2f4   : > { %v1089_v55 = vpop.f32.mrf.mxu1 }
 0x2f5   : > { %v1104_v56 = vsel %vm909_vm4, %v1089_v55, -inf }
 0x2f6   : > { %1105 = vmax.xlane.f32.xlu1 %v1104_v56  ;;  %v1975_v57 = vpop.f32.mrf.mxu1 }
 0x2f8   : > { %v1092_v58 = vpop.f32.mrf.mxu1 }
 0x2fa   : > { %v1976_v59 = vpop.f32.mrf.mxu1 }
 0x367   : > { %v1097_v60 = vpop.xlane.xlu1 %1096 }
 0x368   : > { %v1107_v61 = vsub.f32 %v951_v40, %v1097_v60 }
 0x36a   : > { %v1111_v62 = vmul.f32 1.442695, %v1107_v61 }
 0x36c   : > { %2119 = vpow2.f32 %v1111_v62  ;;  %v1889_v62 = vld [vmem:[%s2760_s29] ss:$0 sm:$0xff] }
 0x36f   : > { %v1100_v63 = vpop.xlane.xlu0 %1099 }
 0x370   : > { %v1108_v0 = vsub.f32 %v997_v45, %v1100_v63 }
 0x372   : > { %v1113_v1 = vmul.f32 1.442695, %v1108_v0 }
 0x374   : > { %2121 = vpow2.f32 %v1113_v1 }
 0x377   : > { %v1103_v3 = vpop.xlane.xlu1 %1102 }
 0x378   : > { %v1109_v5 = vsub.f32 %v1043_v50, %v1103_v3 }
 0x379   : > { %v2120_v6 = vpop.eup %2119 }
 0x37a   : > { %v1115_v7 = vmul.f32 1.442695, %v1109_v5  ;;  %v1119_v8 = vsel %vm909_vm4, %v2120_v6, 0.0 }
 0x37b   : > { %1120 = vadd.xlane.f32.xlu1 %v1119_v8 }
 0x37c   : > { %2123 = vpow2.f32 %v1115_v7 }
 0x37f   : > { %v1106_v9 = vpop.xlane.xlu1 %1105 }
 0x380   : > { %v1110_v10 = vsub.f32 %v1089_v55, %v1106_v9 }
 0x381   : > { %v2122_v11 = vpop.eup %2121 }
 0x382   : > { %v1117_v12 = vmul.f32 1.442695, %v1110_v10  ;;  %v1122_v13 = vsel %vm909_vm4, %v2122_v11, 0.0  ;;  %v2113_v10 = vld [vmem:[%s2478_s13 + $0x8] sm:$0xff]  }
 0x383   : > { %1123 = vadd.xlane.f32.xlu1 %v1122_v13  ;;  %v2116_v13 = vld [vmem:[%s2488_s27 + $0x10] sm:$0xff]  }
 0x384   : > { %2125 = vpow2.f32 %v1117_v12  ;;  %v2115_v12 = vld [vmem:[%s2488_s27 + $0x18] sm:$0xff]  }
 0x389   : > { %v2124_v14 = vpop.eup %2123 }
 0x38a   : > { %v1125_v15 = vsel %vm909_vm4, %v2124_v14, 0.0 }
 0x38b   : > { %1126 = vadd.xlane.f32.xlu1 %v1125_v15 }
 0x391   : > { %v2126_v16 = vpop.eup %2125 }
 0x392   : > { %v1128_v17 = vsel %vm909_vm4, %v2126_v16, 0.0 }
 0x393   : > { %1129 = vadd.xlane.f32.xlu1 %v1128_v17 }
 0x404   : > { %v1121_v18 = vpop.xlane.xlu1 %1120 }
 0x405   : > { %2127 = vrcp.f32 %v1121_v18 }
 0x40c   : > { %v1124_v19 = vpop.xlane.xlu1 %1123 }
 0x40d   : > { %2129 = vrcp.f32 %v1124_v19 }
 0x412   : > { %v2128_v20 = vpop.eup %2127 }
 0x413   : > { %v1135_v21 = vmul.f32 %v2128_v20, %v2120_v6 }
 0x414   : > { %v1127_v26 = vpop.xlane.xlu1 %1126 }
 0x415   : > { %2131 = vrcp.f32 %v1127_v26  ;;  %v1139_v27 = vpack.c.bf16 %v1135_v21, %v1135_v21  ;;  %v1893_v26 = vld [vmem:[%s2761_s25] ss:$0 sm:$0xff] }
 0x417   : > { %v1147_v28 = vsel %vm909_vm4, %v1139_v27, 0 }
 0x418   : > { %1978 = vmatpush3.bf16.xpose.msra.mxu0 %v1147_v28  ;;  %v1894_v28 = vld [vmem:[%s2763_s14] ss:$0 sm:$0xff]  ;;  %s2167_s14 = scalar_lea.vmem %s1659_s30, 128 }
 0x419   : > { %1989 = vmatprep.subr.bf16.mxu0 %v2266_v2  ;;  %p2168_p11 = scmp.ne.s32.totalorder %s1659_s30, %s2167_s14 }
 0x41a   : > { %v2130_v29 = vpop.eup %2129 }
 0x41b   : > { %v1136_v30 = vmul.f32 %v2130_v29, %v2122_v11  ;;  %v2114_v11 = vld [vmem:[%s2478_s13] sm:$0xff]   ;;  %p2169_p1 = pnand %p2168_p11, %p2402_p10 }
 0x41c   : > { %v1130_v31 = vpop.xlane.xlu1 %1129 }
 0x41d   : > { %2133 = vrcp.f32 %v1130_v31  ;;  %v1140_v33 = vpack.c.bf16 %v1136_v30, %v1136_v30  ;;  %p2170_p2 = pneg %p2169_p1 }
 0x41f   : > { %1980 = vmatmul.mubr.msk.bf16.vlgmr.msra.gmra.mxu0 %vm909_vm4, %v905_v32  ;;  %v1193_v34 = vsel %vm909_vm4, %v1140_v33, 0  ;;  %v2117_v32 = vld [vmem:[%s2488_s27 + $0x8] sm:$0xff]   ;;  %v2118_v33 = vld [vmem:[%s2488_s27] sm:$0xff]   ;;  %s2766_s27 = sld [smem:[#allocation20_spill]] }
 0x420   : > { %1984 = vmatpush3.bf16.xpose.msra.mxu1 %v1193_v34  ;;  %1991 = vmatprep.mubr.msk.bf16.mxu0 %vm2267_vm1, %v2266_v2  ;;  %v1895_v34 = vld [vmem:[%s645_s1] ss:$0 sm:$0xff]  ;;  %s2765_s1 = sld [smem:[#allocation11_spill]] }
 0x421   : > { %1995 = vmatprep.subr.bf16.mxu1 %v2266_v2 }
 0x422   : > { %v2132_v35 = vpop.eup %2131 }
 0x423   : > { %v1137_v36 = vmul.f32 %v2132_v35, %v2124_v14 }
 0x425   : > { %v1141_v38 = vpack.c.bf16 %v1137_v36, %v1137_v36  ;;  %s1645_s21 = scalar_lea.sflag [#allocation4], %s2766_s27 }
 0x426   : > { %s1908_s29 = sshll.u32 %s2765_s1, 7 }
 0x427   : > { %1986 = vmatmul.mubr.msk.bf16.vlgmr.msra.gmra.mxu1 %vm909_vm4, %v906_v37  ;;  %v1239_v22 = vsel %vm909_vm4, %v1141_v38, 0  ;;  %s1656_s13 = scalar_lea.hbm %s2770_s24, %s1908_s29 }
 0x428   : > { %1990 = vmatpush3.bf16.xpose.msra.mxu0 %v1239_v22  ;;  %1997 = vmatprep.mubr.msk.bf16.mxu1 %vm2267_vm1, %v2266_v2 }
 0x429   : > { %2001 = vmatprep.subr.bf16.mxu0 %v2266_v2 }
 0x42a   : > { %v2134_v39 = vpop.eup %2133 }
 0x42b   : > { %v1138_v40 = vmul.f32 %v2134_v39, %v2126_v16 }
 0x42d   : > { %v1142_v42 = vpack.c.bf16 %v1138_v40, %v1138_v40 }
 0x42f   : > { %1992 = vmatmul.mubr.msk.bf16.vlgmr.msra.gmra.mxu0 %vm909_vm4, %v907_v41  ;;  %v1285_v23 = vsel %vm909_vm4, %v1142_v42, 0 }
 0x430   : > { %1996 = vmatpush3.bf16.xpose.msra.mxu1 %v1285_v23  ;;  %2005 = vmatprep.mubr.msk.bf16.mxu0 %vm2267_vm1, %v2266_v2 }
 0x431   : > { %2009 = vmatprep.subr.bf16.mxu1 %v2266_v2  ;;  %2002 = vmatpush3.bf16.msra.mxu0 %v2111_v24 }
 0x432   : > { %2003 = vmatprep.subr.bf16.mxu0 %v2266_v2 }
 0x435   : > { %2004 = vmatpush3.bf16.msra.mxu0 %v2112_v44 }
 0x436   : > { %2017 = vmatprep.subr.bf16.mxu0 %v2266_v2 }
 0x437   : > { %1998 = vmatmul.mubr.msk.bf16.vlgmr.msra.gmra.mxu1 %vm909_vm4, %v908_v43 }
 0x438   : > { %2013 = vmatprep.mubr.msk.bf16.mxu1 %vm2267_vm1, %v2266_v2  ;;  %2010 = vmatpush3.bf16.msra.mxu1 %v2113_v10 }
 0x439   : > { %2011 = vmatprep.subr.bf16.mxu1 %v2266_v2 }
 0x43c   : > { %2012 = vmatpush3.bf16.msra.mxu1 %v2114_v11 }
 0x4df   : > { %v1183_v45 = vpop.f32.mrf.mxu0 }
 0x4e0   : > { %1327 = vxpose.xlu1.b32.start [1/4] (short) (narrow) %v1183_v45, 8 }
 0x4e1   : > { %v1981_v46 = vpop.f32.mrf.mxu0 }
 0x4e3   : > { %v1186_v47 = vpop.f32.mrf.mxu0 }
 0x4e5   : > { %v1982_v48 = vpop.f32.mrf.mxu0 }
 0x4e7   : > { %v1229_v49 = vpop.f32.mrf.mxu1 }
 0x4e8   : > { %1328 = vxpose.xlu1.b32.cont [2/4] (short) (narrow) %v1229_v49, 8 }
 0x4e9   : > { %v1987_v25 = vpop.f32.mrf.mxu1 }
 0x4eb   : > { %v1232_v50 = vpop.f32.mrf.mxu1 }
 0x4ed   : > { %v1988_v51 = vpop.f32.mrf.mxu1 }
 0x4ef   : > { %v1275_v52 = vpop.f32.mrf.mxu0 }
 0x4f0   : > { %1329 = vxpose.xlu1.b32.cont [3/4] (short) (narrow) %v1275_v52, 8 }
 0x4f1   : > { %v1993_v53 = vpop.f32.mrf.mxu0 }
 0x4f3   : > { %v1278_v54 = vpop.f32.mrf.mxu0 }
 0x4f5   : > { %v1994_v55 = vpop.f32.mrf.mxu0 }
 0x4f7   : > { %v1321_v56 = vpop.f32.mrf.mxu1 }
 0x4f8   : > { %1330 = vxpose.xlu1.b32.end [4/4] (short) (narrow) %v1321_v56, 8  ;;  %v1905_v56 = vld [vmem:[%s656_s22] ss:$0 sm:$0xff]  ;;  %s2268_s22 = smov [#allocation5]  }
 0x4f9   : > { %v1999_v57 = vpop.f32.mrf.mxu1  ;;  %s2171_s10 = sshll.u32 %s2268_s22, 4  ;;  %s2172_s10 = int_to_ptr.vmem [resolvable:$false] %s2171_s10 }
 0x4fa   : > { %p2174_p4 = scmp.lt.s32.totalorder %s1659_s30, %s2172_s10 }
 0x4fb   : > { %v1324_v58 = vpop.f32.mrf.mxu1 }
 0x4fc   : > { %v1906_v58 = vld [vmem:[%s659_s6] ss:$0 sm:$0xff]  ;;  %s2173_s6 = scalar_lea.vmem %s2172_s10, 256 }
 0x4fd   : > { %v2000_v59 = vpop.f32.mrf.mxu1  ;;  %p2175_p5 = scmp.lt.s32.totalorder %s2173_s6, %s2167_s14 }
 0x4ff   : > { %p2176_p6 = por %p2175_p5, %p2174_p4 }
 0x501   : > { %p2177_p7 = pnand %p2176_p6, %p2170_p2 }
 0x568   : > { %v1343_v60 = vpop.trf.xlu1 }
 0x569   : > { %v1359_v61 = vpack.c.bf16 %v1343_v60, %v1343_v60 }
 0x56b   : > { %2006 = vmatmul.mubr.msk.bf16.vlgmr.msra.gmra.mxu0 %vm693_vm2, %v1359_v61 }
 0x56c   : > { %2025 = vmatprep.mubr.msk.bf16.mxu0 %vm2267_vm1, %v2266_v2  ;;  %2018 = vmatpush3.bf16.msra.mxu0 %v2115_v12 }
 0x56d   : > { %2019 = vmatprep.subr.bf16.mxu0 %v2266_v2 }
 0x570   : > { %2020 = vmatpush3.bf16.msra.mxu0 %v2116_v13 }
 0x571   : > { %2021 = vmatprep.subr.bf16.mxu0 %v2266_v2 }
 0x574   : > { %2022 = vmatpush3.bf16.msra.mxu0 %v2117_v32 }
 0x575   : > { %2023 = vmatprep.subr.bf16.mxu0 %v2266_v2  ;;  %v1899_v2 = vld [vmem:[%s653_s23] ss:$0 sm:$0xff] }
 0x578   : > { %2024 = vmatpush3.bf16.msra.mxu0 %v2118_v33 }
 0x62b   : > { %v1420_v63 = vpop.f32.mrf.mxu0 }
 0x62c   : > { %v1421_v0 = vadd.f32 %v1889_v62, %v1420_v63 }
 0x62d   : > { %v2007_v1 = vpop.f32.mrf.mxu0 }
 0x62e   : > { %v1426_v3 = vadd.f32 %v1421_v0, %v2511_v4 }
 0x62f   : > { %v1423_v5 = vpop.f32.mrf.mxu0 }
 0x630   : > { %v1429_v6 = vsel %vm693_vm2, %v1426_v3, 0.0  ;;  %v1434_v7 = vmul.f32 %v1426_v3, %v1426_v3 }
 0x631   : > { %1430 = vadd.xlane.f32.xlu0 %v1429_v6  ;;  %v2008_v8 = vpop.f32.mrf.mxu0 }
 0x632   : > { %v1435_v9 = vsel %vm693_vm2, %v1434_v7, 0.0 }
 0x635   : > { %1436 = vadd.xlane.f32.xlu0 %v1435_v9 }
 0x6ba   : > { %v1431_v4 = vpop.xlane.xlu0 %1430 }
 0x6bb   : > { %v1433_v14 = vmul.f32 0.03125, %v1431_v4 }
 0x6bd   : > { %v1439_v16 = vmul.f32 %v1433_v14, %v1433_v14  ;;  %v1441_v20 = vsub.f32 %v1426_v3, %v1433_v14 }
 0x6be   : > { %v1437_v15 = vpop.xlane.xlu0 %1436 }
 0x6bf   : > { %v1438_v17 = vmul.f32 0.03125, %v1437_v15 }
 0x6c1   : > { %v1440_v18 = vsub.f32 %v1438_v17, %v1439_v16 }
 0x6c3   : > { %v1442_v19 = vadd.f32 1e-05, %v1440_v18 }
 0x6c5   : > { %2135 = vrsqrt.f32 %v1442_v19 }
 0x6d2   : > { %v2136_v21 = vpop.eup %2135 }
 0x6d3   : > { %v1444_v27 = vmul.f32 %v2136_v21, %v1441_v20 }
 0x6d5   : > { %v1451_v29 = vmul.f32 %v1893_v26, %v1444_v27 }
 0x6d7   : > { %v1458_v30 = vadd.f32 %v1894_v28, %v1451_v29 }
 0x6d9   : > { %v1464_v31 = vpack.c.bf16 %v1458_v30, %v1458_v30 }
 0x6db   : > { %2014 = vmatmul.mubr.msk.bf16.vlgmr.msra.gmra.mxu1 %vm693_vm2, %v1464_v31 }
 0x79b   : > { %v1520_v35 = vpop.f32.mrf.mxu1 }
 0x79c   : > { %v1521_v36 = vadd.f32 %v1895_v34, %v1520_v35 }
 0x79d   : > { %v2015_v37 = vpop.f32.mrf.mxu1 }
 0x79e   : > { %v1526_v38 = vmax.f32 %v1521_v36, 0.0 }
 0x79f   : > { %v1523_v22 = vpop.f32.mrf.mxu1 }
 0x7a0   : > { %v1536_v39 = vpack.c.bf16 %v1526_v38, %v1526_v38 }
 0x7a1   : > { %v2016_v40 = vpop.f32.mrf.mxu1 }
 0x7a2   : > { %2026 = vmatmul.mubr.msk.bf16.vlgmr.msra.gmra.mxu0 %vm1567_vm5, %v1536_v39 }
 0x862   : > { %v1605_v41 = vpop.f32.mrf.mxu0 }
 0x863   : > { %v1606_v42 = vadd.f32 %v1899_v2, %v1605_v41 }
 0x864   : > { %v2027_v23 = vpop.f32.mrf.mxu0 }
 0x865   : > { %v1611_v43 = vadd.f32 %v1606_v42, %v1458_v30 }
 0x866   : > { %v1608_v24 = vpop.f32.mrf.mxu0 }
 0x867   : > { %v1614_v44 = vsel %vm693_vm2, %v1611_v43, 0.0  ;;  %v1618_v45 = vmul.f32 %v1611_v43, %v1611_v43 }
 0x868   : > { %1615 = vadd.xlane.f32.xlu0 %v1614_v44  ;;  %v2028_v46 = vpop.f32.mrf.mxu0 }
 0x869   : > { %v1619_v47 = vsel %vm693_vm2, %v1618_v45, 0.0 }
 0x86c   : > { %1620 = vadd.xlane.f32.xlu0 %v1619_v47 }
 0x8f1   : > { %v1616_v48 = vpop.xlane.xlu0 %1615 }
 0x8f2   : > { %v1617_v49 = vmul.f32 0.03125, %v1616_v48 }
 0x8f4   : > { %v1623_v50 = vmul.f32 %v1617_v49, %v1617_v49  ;;  %v1625_v54 = vsub.f32 %v1611_v43, %v1617_v49 }
 0x8f5   : > { %v1621_v25 = vpop.xlane.xlu0 %1620 }
 0x8f6   : > { %v1622_v51 = vmul.f32 0.03125, %v1621_v25 }
 0x8f8   : > { %v1624_v52 = vsub.f32 %v1622_v51, %v1623_v50 }
 0x8fa   : > { %v1626_v53 = vadd.f32 1e-05, %v1624_v52 }
 0x8fc   : > { %2137 = vrsqrt.f32 %v1626_v53 }
 0x909   : > { %v2138_v55 = vpop.eup %2137 }
 0x90a   : > { %v1628_v57 = vmul.f32 %v2138_v55, %v1625_v54 }
 0x90c   : > { %v1635_v59 = vmul.f32 %v1905_v56, %v1628_v57 }
 0x90e   : > { %v1642_v60 = vadd.f32 %v1906_v58, %v1635_v59 }
 0x910   : > { %1643 = vst.msk [vmem:[%s2502_s11] sm:$0xff] %vm693_vm2, %v1642_v60 }
 0x911   : > { %2180 = shalt.err (!%p2177_p7)
}
 0x912   : > { %s2181_s17 = scalar_lea.hbm %s1656_s13, 128  ;;  %s2185_s18 = scalar_lea.hbm %s2770_s24, 256 }
 0x913   : > { %p2182_p8 = scmp.ne.s32.totalorder %s1656_s13, %s2181_s17  ;;  %p2186_p13 = scmp.lt.s32.totalorder %s1656_s13, %s2770_s24 }
 0x914   : > { %p2187_p0 = scmp.lt.s32.totalorder %s2185_s18, %s2181_s17 }
 0x915   : > { %p2183_p12 = pnand %p2182_p8, %p2402_p10 }
 0x916   : > { %p2188_p9 = por %p2187_p0, %p2186_p13 }
 0x917   : > { %p2184_p3 = pneg %p2183_p12 }
 0x919   : > { %p2189_p11 = pnand %p2188_p9, %p2184_p3 }
 0x91b   : > { %2192 = shalt.err (!%p2189_p11)
}
 0x91c   : > { %2031 = dma.vmem_to_hbm [thread:$0]  (%p2402_p10), %s1659_s30, 128, %s1656_s13, %s1645_s21  }
 0x91d PF: > { %s2771_s1 = sld [smem:[#allocation14_spill]] }
 0x91e   : > { %s2772_s27 = sld [smem:[#allocation8_spill]] }
 0x91f   : > { %s2773_s20 = sld [smem:[#allocation18_spill]] }
 0x923   : > { %p2042_p1 = scmp.ge.s32.totalorder %s2771_s1, 2 }
 0x924   : > { %s1670_s3 = sand.u32 1, %s2772_s27  }
 0x925   : > { %p2774_p2 = scmp.ne.s32.totalorder %s2773_s20, 0  ;;  %s1671_s7 = scalar_lea.sflag [#allocation4], %s1670_s3 }
 0x927   : > { %p2038_p4 = pnand %p2042_p1, %p2774_p2 }
 0x929   : > { %p2039_p5 = pneg %p2038_p4 }
 0x92b   : > { %2230 = dma.done.wait (%p2039_p5), %s1671_s7, 128  }
 0x92c   : > { %2232 = vsyncadd (%p2039_p5), %s1671_s7, 4294967168  ;;  %s29_s15 = sadd.s32 1, %s2771_s1   ;;  %s2775_s25 = sld [smem:[#allocation9_spill]] }
 0x92d   : > { %p26_p6 = scmp.ge.s32.totalorder %s29_s15, 6   ;;  %s2776_s26 = sld [smem:[#allocation10_spill]] }
 0x92e   : > { %s2777_s27 = sld [smem:[#allocation19_spill]] }
 0x92f   : > { %s2778_s28 = sld [smem:[#allocation12_spill]]  ;;  %28 = sbr.rel (!%p26_p6) target bundleno = 17 (0x11), region = 157 }
 0x930   : > { %s2779_s29 = sld [smem:[#allocation13_spill]] }
 0x931   : > { %s2780_s30 = sld [smem:[#allocation15_spill]] }
 0x932   : > { %s2781_s14 = sld [smem:[#allocation16_spill]] }
 0x934   :  { %1676 = vsyncpa [#allocation3], 1 }
 0x935   :  { %1678 = vsyncpa [#allocation3 + $0x1], 1 }
 0x936   :  { %1679 = vsyncpa [#allocation4], 1 }
 0x937   :  { %1681 = vsyncpa [#allocation4 + $0x1], 1 }

</bundles_post_ra>
